<compile_context>
chip_gen: v6e
topology: v6e:2x2x1
jax: 0.10.0
libtpu: 0.0.40
codegen_flags: <defaults>
</compile_context>

<pallas_src>
import jax
import jax.numpy as jnp
from jax.experimental import pallas as pl
from jax.experimental.pallas import tpu as pltpu


def _round_up(x, m):
    return ((x + m - 1) // m) * m


def _hand_type_kernel(x_ref, w_ref, b_ref, reg_ref, prob_ref):
    """Transposed-layout linear + softmax: results are (T, bt) with batch on lanes."""
    x = x_ref[...]                      # (bt, D)  native dtype (f32 / bf16)
    w = w_ref[...]                      # (T,  D)  native nn.Linear layout
    b = b_ref[...]                      # (T,  1)  float32

    # logits^T = W @ x^T  (contract D on both operands; MXU, f32 accumulation)
    logits = jax.lax.dot_general(
        w, x,
        dimension_numbers=(((1,), (1,)), ((), ())),
        preferred_element_type=jnp.float32,
    ) + b                               # (T, bt) float32
    reg_ref[...] = logits.astype(reg_ref.dtype)

    # Softmax over the type axis (axis 0); reciprocal on the EUP (approx) slot.
    t_max = jnp.max(logits, axis=0, keepdims=True)          # (1, bt)
    e = jnp.exp(logits - t_max)
    denom = jnp.sum(e, axis=0, keepdims=True)                # (1, bt)
    prob_ref[...] = (e * pl.reciprocal(denom, approx=True)).astype(prob_ref.dtype)


def hand_type_classification_branch(hand_feature, weight, bias, *, batch_tile=4096):
    """hand_feature: (B, D); weight: (T, D) (native PyTorch layout); bias: (T,)."""
    B, D = hand_feature.shape
    T = weight.shape[0]
    out_dtype = hand_feature.dtype
    in_itemsize = jnp.dtype(hand_feature.dtype).itemsize
    out_itemsize = jnp.dtype(out_dtype).itemsize

    # --- batch tile selection -------------------------------------------------
    if B <= 256:
        bt = B                              # single full-B tile (full-array blocks)
    else:
        # >=2 grid steps so v7x megacore engages; bt is on the lane axis of the
        # outputs and the sublane axis of x, so keep it a multiple of 128.
        bt = min(_round_up(batch_tile, 128), _round_up(pl.cdiv(B, 2), 128))

    # VMEM guard: double-buffered x + resident W/b + double-buffered (T, bt) outputs.
    # Conservative 24 MiB budget so a scaled-up D or tile still fits v7x's 64 MiB VMEM.
    def _vmem_bytes(bt_):
        return (2 * bt_ * D * in_itemsize
                + T * D * in_itemsize + T * 4
                + 2 * 2 * T * bt_ * out_itemsize)
    while bt > 256 and _vmem_bytes(bt) > 24 * 1024 * 1024:
        bt = max(256, _round_up(bt // 2, 128))

    grid = (pl.cdiv(B, bt),)
    bias_col = bias.reshape(T, 1).astype(jnp.float32)
    w = weight.astype(hand_feature.dtype)    # keep both MXU operands in one native dtype

    cost = pl.CostEstimate(
        flops=2 * B * D * T + 6 * B * T,
        transcendentals=B * T,
        bytes_accessed=(B * D * in_itemsize + T * D * in_itemsize + T * 4
                        + 2 * B * T * out_itemsize),
    )

    reg_t, prob_t = pl.pallas_call(
        _hand_type_kernel,
        out_shape=(
            jax.ShapeDtypeStruct((T, B), out_dtype),     # reg_outs^T
            jax.ShapeDtypeStruct((T, B), out_dtype),     # reg_possibilities^T
        ),
        grid=grid,
        in_specs=[
            pl.BlockSpec((bt, D), lambda i: (i, 0)),     # x: tiled over batch
            pl.BlockSpec((T, D), lambda i: (0, 0)),      # W: VMEM-resident across tiles
            pl.BlockSpec((T, 1), lambda i: (0, 0)),      # b: VMEM-resident across tiles
        ],
        out_specs=(
            pl.BlockSpec((T, bt), lambda i: (0, i)),     # lane-dense stores (batch on lanes)
            pl.BlockSpec((T, bt), lambda i: (0, i)),
        ),
        compiler_params=pltpu.CompilerParams(
            dimension_semantics=("parallel",),           # shard batch tiles across TCs (v7x)
        ),
        cost_estimate=cost,
    )(hand_feature, w, bias_col)

    reg = reg_t.T                                        # (B, T)
    probs = prob_t.T                                     # (B, T)
    # Argmax over T (tiny) done in XLA: first-max index == torch.max(·, 1) indices.
    labels = jnp.argmax(reg_t, axis=0).astype(jnp.int32)
    return {
        "reg_outs": reg,
        "pred_labels": labels,
        "reg_possibilities": probs,
    }


if __name__ == "__main__":
    # Small shapes consistent with the module: batch=8, hand_feature_dim=32, num_types=8
    B, D, T = 8, 32, 8

    key = jax.random.PRNGKey(0)
    k_x, k_w, k_b = jax.random.split(key, 3)

    hand_feature = jax.random.normal(k_x, (B, D), dtype=jnp.float32)
    # Deterministic parameter init (mimics nn.Linear uniform(-1/sqrt(D), 1/sqrt(D)))
    bound = 1.0 / (D ** 0.5)
    weight = jax.random.uniform(k_w, (T, D), minval=-bound, maxval=bound, dtype=jnp.float32)
    bias = jax.random.uniform(k_b, (T,), minval=-bound, maxval=bound, dtype=jnp.float32)

    out = hand_type_classification_branch(hand_feature, weight, bias)
    jax.block_until_ready(out)

    # Sanity check against plain-JAX reference (tolerances loosened for the approx
    # EUP reciprocal in the softmax).
    ref_logits = jax.lax.dot_general(
        hand_feature, weight,
        dimension_numbers=(((1,), (1,)), ((), ())),
        precision=jax.lax.Precision.HIGHEST,
    ) + bias
    ref_labels = jnp.argmax(ref_logits, axis=1).astype(jnp.int32)
    ref_probs = jax.nn.softmax(ref_logits, axis=1)
    assert out["reg_outs"].shape == (B, T)
    assert out["pred_labels"].shape == (B,)
    assert out["reg_possibilities"].shape == (B, T)
    assert jnp.allclose(out["reg_outs"], ref_logits, atol=1e-3, rtol=1e-3)
    assert jnp.all(out["pred_labels"] == ref_labels)
    assert jnp.allclose(out["reg_possibilities"], ref_probs, atol=2e-3)

    print("KERNEL_OK")
</pallas_src>

<mosaic_0001>
module attributes {stable_mosaic.version = 11 : i64} {
  func.func @_hand_type_kernel(%arg0: i32, %arg1: memref<8x32xf32, #tpu.memory_space<vmem>>, %arg2: memref<8x32xf32, #tpu.memory_space<vmem>>, %arg3: memref<8x1xf32, #tpu.memory_space<vmem>>, %arg4: memref<8x8xf32, #tpu.memory_space<vmem>>, %arg5: memref<8x8xf32, #tpu.memory_space<vmem>>) attributes {dimension_semantics = [#tpu.dimension_semantics<parallel>], iteration_bounds = array<i64: 1>, scalar_prefetch = 0 : i64, scratch_operands = 0 : i64, tpu.core_type = #tpu.core_type<tc>, window_params = [{transform_indices = @transform_0, window_bounds = array<i64: 8, 32>}, {pipeline_mode = #tpu.pipeline_mode<synchronous>, transform_indices = @transform_1, window_bounds = array<i64: 8, 32>}, {pipeline_mode = #tpu.pipeline_mode<synchronous>, transform_indices = @transform_2, window_bounds = array<i64: 8, 1>}, {transform_indices = @transform_3, window_bounds = array<i64: 8, 8>}, {transform_indices = @transform_4, window_bounds = array<i64: 8, 8>}]} {
    %c0 = arith.constant 0 : index
    %c0_0 = arith.constant 0 : index
    %0 = vector.load %arg1[%c0, %c0_0] : memref<8x32xf32, #tpu.memory_space<vmem>>, vector<8x32xf32>
    %c0_1 = arith.constant 0 : index
    %c0_2 = arith.constant 0 : index
    %1 = vector.load %arg2[%c0_1, %c0_2] : memref<8x32xf32, #tpu.memory_space<vmem>>, vector<8x32xf32>
    %c0_3 = arith.constant 0 : index
    %c0_4 = arith.constant 0 : index
    %2 = vector.load %arg3[%c0_3, %c0_4] : memref<8x1xf32, #tpu.memory_space<vmem>>, vector<8x1xf32>
    %cst = arith.constant dense<0.000000e+00> : vector<8x8xf32>
    %3 = tpu.matmul %1, %0, %cst {dimension_numbers = #tpu.dot_dimension_numbers<[1], [1], [0], [0], [0, 0, 1, 0], [], []>} : vector<8x32xf32>, vector<8x32xf32>, vector<8x8xf32> -> vector<8x8xf32>
    %4 = vector.broadcast %2 : vector<8x1xf32> to vector<8x8xf32>
    %5 = arith.addf %3, %4 : vector<8x8xf32>
    %c0_5 = arith.constant 0 : index
    %c0_6 = arith.constant 0 : index
    %6 = vector.load %arg4[%c0_5, %c0_6] : memref<8x8xf32, #tpu.memory_space<vmem>>, vector<8x8xf32>
    tpu.vector_store %arg4[%c0_5, %c0_6], %5 {strides = array<i32>} : memref<8x8xf32, #tpu.memory_space<vmem>>, vector<8x8xf32>,
    %cst_7 = arith.constant dense<0xFF800000> : vector<8xf32>
    %7 = vector.multi_reduction <maximumf>, %5, %cst_7 [0] : vector<8x8xf32> to vector<8xf32>
    %8 = vector.shape_cast %7 : vector<8xf32> to vector<1x8xf32>
    %9 = vector.broadcast %8 : vector<1x8xf32> to vector<8x8xf32>
    %10 = arith.subf %5, %9 : vector<8x8xf32>
    %11 = math.exp %10 : vector<8x8xf32>
    %cst_8 = arith.constant dense<0.000000e+00> : vector<8xf32>
    %12 = vector.multi_reduction <add>, %11, %cst_8 [0] : vector<8x8xf32> to vector<8xf32>
    %13 = vector.shape_cast %12 : vector<8xf32> to vector<1x8xf32>
    %14 = tpu.reciprocal %13 {approx = true} : vector<1x8xf32> -> vector<1x8xf32>
    %15 = vector.broadcast %14 : vector<1x8xf32> to vector<8x8xf32>
    %16 = arith.mulf %11, %15 : vector<8x8xf32>
    %c0_9 = arith.constant 0 : index
    %c0_10 = arith.constant 0 : index
    %17 = vector.load %arg5[%c0_9, %c0_10] : memref<8x8xf32, #tpu.memory_space<vmem>>, vector<8x8xf32>
    tpu.vector_store %arg5[%c0_9, %c0_10], %16 {strides = array<i32>} : memref<8x8xf32, #tpu.memory_space<vmem>>, vector<8x8xf32>,
    return
  }
  func.func @transform_0(%arg0: i32) -> (i32, i32) {
    %c0_i32 = arith.constant 0 : i32
    %c0_i32_0 = arith.constant 0 : i32
    return %arg0, %c0_i32 : i32, i32
  }
  func.func @transform_1(%arg0: i32) -> (i32, i32) {
    %c0_i32 = arith.constant 0 : i32
    %c0_i32_0 = arith.constant 0 : i32
    %c0_i32_1 = arith.constant 0 : i32
    return %c0_i32, %c0_i32_0 : i32, i32
  }
  func.func @transform_2(%arg0: i32) -> (i32, i32) {
    %c0_i32 = arith.constant 0 : i32
    %c0_i32_0 = arith.constant 0 : i32
    %c0_i32_1 = arith.constant 0 : i32
    return %c0_i32, %c0_i32_0 : i32, i32
  }
  func.func @transform_3(%arg0: i32) -> (i32, i32) {
    %c0_i32 = arith.constant 0 : i32
    %c0_i32_0 = arith.constant 0 : i32
    return %c0_i32, %arg0 : i32, i32
  }
  func.func @transform_4(%arg0: i32) -> (i32, i32) {
    %c0_i32 = arith.constant 0 : i32
    %c0_i32_0 = arith.constant 0 : i32
    return %c0_i32, %arg0 : i32, i32
  }
}

</mosaic_0001>

<bundles_post_ra>
// kernel: tpu_custom_call.1
= control target key start
LH: loop header
LB: loop body
LE: loop exit
PB: predicated region body
PF: predicated region fallthrough
CT: control target
= control target key end

     0   :  { %10 = vsyncpa [#allocation3], 0  ;;  %s302_s0 = inlined_call_operand.vmem [shape: f32[8,32], index: 0, kind: input, shape index: {}]   ;;  %s303_s1 = inlined_call_operand.hbm [shape: f32[8,32], index: 1, kind: input, shape index: {}]   ;;  %s304_s2 = inlined_call_operand.vmem [shape: f32[8,1], index: 2, kind: input, shape index: {}]   ;;  %s305_s3 = inlined_call_operand.hbm [shape: f32[8,8], index: 3, kind: output, shape index: {0}]   ;;  %s306_s4 = inlined_call_operand.hbm [shape: f32[8,8], index: 4, kind: output, shape index: {1}]  }
   0x1   :  { %11 = vsyncpa [#allocation4], 0 }
   0x2   :  { %12 = vsyncpa [#allocation7], 0  ;;  %s252_s15 = smov [#allocation2]  }
   0x3   :  { %s21_s16 = sshll.u32 %s252_s15, 4  ;;  %s22_s16 = int_to_ptr.vmem [resolvable:$true] %s21_s16 }
   0x4   :  { %s194_s17 = scalar_lea.vmem %s22_s16, 128  ;;  %p199_p1 = scmp.lt.s32.totalorder %s22_s16, %s22_s16 }
   0x5   :  { %p195_p0 = scmp.ne.s32.totalorder %s22_s16, %s194_s17  ;;  %p200_p2 = scmp.lt.s32.totalorder %s194_s17, %s194_s17 }
   0x7   :  { %p201_p3 = por %p200_p2, %p199_p1 }
   0x9   :  { %p202_p4 = pnand %p201_p3, %p195_p0 }
   0xb   :  { %205 = shalt.err (!%p202_p4)
}
   0xc   :  { %24 = dma.hbm_to_vmem [thread:$0]  %s303_s1, 128, %s22_s16, [#allocation3]  }
   0xd   :  { %246 = dma.done.wait [#allocation3], 128  }
   0xe   :  { %247 = vsyncadd [#allocation3], 4294967168  ;;  %v253_v0 = vmov 0.0   ;;  %vm254_vm0 = vmmov 0   ;;  %v255_v1 = vmov 0   ;;  %vm38_vm1 = vcmask 261120  }
   0xf   :  { %170 = vmatprep.subr.mxu0 %v253_v0  ;;  %172 = vmatprep.mubr.msk.f32.mxu0 %vm254_vm0, %v253_v0  ;;  %v30_v2 = vld [vmem:[%s302_s0] sm:$0xff]  ;;  %s256_s1 = smov [#allocation5]   ;;  %vm115_vm2 = vcmask 64512  }
  0x10   :  { %181 = vset.pattern.permute.xlu0 %v255_v1  ;;  %v32_v3 = vld [vmem:[%s304_s2] sm:$0xff]  ;;  %171 = vmatpush3.xpose.msk.msra.mxu0 %vm38_vm1, %v30_v2  ;;  %s143_s24 = sshll.u32 %s256_s1, 4  ;;  %s144_s24 = int_to_ptr.vmem [resolvable:$true] %s143_s24 }
  0x11   :  { %v31_v4 = vld [vmem:[#allocation2] sm:$0xff]  ;;  %35 = vperm.xlu0 %181, %v32_v3   ;;  %s206_s0 = scalar_lea.vmem %s144_s24, 128  ;;  %p211_p6 = scmp.lt.s32.totalorder %s144_s24, %s144_s24 }
  0x12   :  { %p207_p5 = scmp.ne.s32.totalorder %s144_s24, %s206_s0  ;;  %p212_p7 = scmp.lt.s32.totalorder %s206_s0, %s206_s0 }
  0x13   :  { %173 = vmatmul.mubr.msk.f32.vlgmr.msra.gmra.mxu0 %vm38_vm1, %v31_v4 }
  0x14   :  { %p213_p8 = por %p212_p7, %p211_p6 }
  0x16   :  { %p214_p9 = pnand %p213_p8, %p207_p5 }
  0x8c   :  { %v36_v5 = vpop.permute.xlu0 %35 }
  0xd3   :  { %v111_v6 = vpop.f32.mrf.mxu0 }
  0xd4   :  { %v112_v7 = vadd.f32 %v111_v6, %v36_v5 }
  0xd5   :  { %v174_v8 = vpop.f32.mrf.mxu0 }
  0xd6   :  { %v117_v9 = vsel %vm115_vm2, %v112_v7, -inf  ;;  %116 = vst.msk [vmem:[#allocation5] sm:$0xff] %vm115_vm2, %v112_v7 }
  0xd7   :  { %v118_v10 = vrot.slane %v117_v9, 4 }
  0xd8   :  { %217 = shalt.err (!%p214_p9)
}
  0xd9   :  { %146 = dma.vmem_to_hbm [thread:$0]  %s144_s24, 128, %s305_s3, [#allocation4]   ;;  %v119_v11 = vmax.f32 %v117_v9, %v118_v10 }
  0xda   :  { %s257_s26 = smov [#allocation6]  }
  0xdb   :  { %v120_v12 = vrot.slane %v119_v11, 2  ;;  %s153_s3 = sshll.u32 %s257_s26, 4  ;;  %s154_s3 = int_to_ptr.vmem [resolvable:$true] %s153_s3 }
  0xdc   :  { %s226_s27 = scalar_lea.vmem %s154_s3, 128  ;;  %p231_p11 = scmp.lt.s32.totalorder %s154_s3, %s154_s3 }
  0xdd   :  { %v121_v13 = vmax.f32 %v119_v11, %v120_v12  ;;  %p227_p10 = scmp.ne.s32.totalorder %s154_s3, %s226_s27  ;;  %p232_p12 = scmp.lt.s32.totalorder %s226_s27, %s226_s27 }
  0xdf   :  { %v122_v14 = vrot.slane %v121_v13, 1  ;;  %p233_p13 = por %p232_p12, %p231_p11 }
  0xe1   :  { %v123_v15 = vmax.f32 %v121_v13, %v122_v14  ;;  %p234_p0 = pnand %p233_p13, %p227_p10 }
  0xe3   :  { %v124_v16 = vsub.f32 %v112_v7, %v123_v15 }
  0xe5   :  { %v125_v17 = vmul.f32 1.442695, %v124_v16 }
  0xe7   :  { %182 = vpow2.f32 %v125_v17 }
  0xf4   :  { %v183_v18 = vpop.eup %182 }
  0xf5   :  { %v127_v19 = vsel %vm115_vm2, %v183_v18, 0.0 }
  0xf6   :  { %v128_v20 = vrot.slane %v127_v19, 4 }
  0xf8   :  { %v129_v21 = vadd.f32 %v128_v20, %v127_v19 }
  0xfa   :  { %v130_v22 = vrot.slane %v129_v21, 2 }
  0xfc   :  { %v131_v23 = vadd.f32 %v130_v22, %v129_v21 }
  0xfe   :  { %v132_v24 = vrot.slane %v131_v23, 1 }
 0x100   :  { %v133_v25 = vadd.f32 %v132_v24, %v131_v23 }
 0x102   :  { %184 = vrcp.f32 %v133_v25 }
 0x10f   :  { %v185_v26 = vpop.eup %184 }
 0x110   :  { %v135_v27 = vmul.f32 %v185_v26, %v183_v18 }
 0x112   :  { %136 = vst.msk [vmem:[#allocation6] sm:$0xff] %vm115_vm2, %v135_v27 }
 0x113   :  { %237 = shalt.err (!%p234_p0)
}
 0x114   :  { %156 = dma.vmem_to_hbm [thread:$0]  %s154_s3, 128, %s306_s4, [#allocation7]  }
 0x115   :  { %248 = dma.done.wait [#allocation4], 128  }
 0x116   :  { %249 = vsyncadd [#allocation4], 4294967168 }
 0x117   :  { %250 = dma.done.wait [#allocation7], 128  }
 0x118   :  { %251 = vsyncadd [#allocation7], 4294967168 }
 0x119   :  { %163 = vsyncpa [#allocation3], 1 }
 0x11a   :  { %164 = vsyncpa [#allocation4], 1 }
 0x11b   :  { %165 = vsyncpa [#allocation7], 1 }

</bundles_post_ra>
